<compile_context>
chip_gen: v5e
topology: v5e:2x2
jax: 0.10.0
libtpu: 0.0.40
codegen_flags: <defaults>
</compile_context>

<pallas_src>
import jax
import jax.numpy as jnp
import numpy as np
from jax.experimental import pallas as pl
from jax.experimental.pallas import tpu as pltpu


# ---------------------------------------------------------------------------
# Glue: 1-D interpolation weight matrix (out_size, in_size), PyTorch semantics.
# ---------------------------------------------------------------------------
def _interp_matrix(out_size: int, in_size: int, mode: str) -> jnp.ndarray:
    dst = jnp.arange(out_size, dtype=jnp.float32)
    scale = in_size / out_size
    if mode == "nearest":
        # PyTorch legacy 'nearest': src = floor(dst * in/out)
        src = jnp.floor(dst * scale).astype(jnp.int32)
        src = jnp.clip(src, 0, in_size - 1)
        return jax.nn.one_hot(src, in_size, dtype=jnp.float32)
    elif mode in ("bilinear", "linear"):
        # align_corners=False (PyTorch default): half-pixel centers.
        src = (dst + 0.5) * scale - 0.5
        src = jnp.clip(src, 0.0, float(in_size - 1))
        lo = jnp.floor(src).astype(jnp.int32)
        hi = jnp.minimum(lo + 1, in_size - 1)
        w_hi = src - lo.astype(jnp.float32)
        w_lo = 1.0 - w_hi
        return (jax.nn.one_hot(lo, in_size, dtype=jnp.float32) * w_lo[:, None]
                + jax.nn.one_hot(hi, in_size, dtype=jnp.float32) * w_hi[:, None])
    else:
        # TODO(synk): bicubic / area / trilinear interpolate modes not implemented.
        raise NotImplementedError(f"mode={mode}")


# ---------------------------------------------------------------------------
# Pallas kernel: one block of B planes (B, H_in, W_in) -> (B, H_out, W_out).
# ---------------------------------------------------------------------------
def _interp_kernel(x_ref, rwt_ref, rh_ref, o_ref):
    b, h_in, w_in = x_ref.shape
    # W-resize fused over (plane, row): one large MXU matmul
    #   (B*H_in, W_in) @ (W_in, W_out) -> (B*H_in, W_out)
    xw = jnp.dot(x_ref[...].reshape(b * h_in, w_in), rwt_ref[...],
                 preferred_element_type=jnp.float32)
    rh = rh_ref[...]
    # H-resize: short unrolled loop over the B planes of this block.
    for i in range(b):
        y = jnp.dot(rh, xw[i * h_in:(i + 1) * h_in, :],
                    preferred_element_type=jnp.float32)
        o_ref[i] = y.astype(o_ref.dtype)


def _pick_block_planes(p, h_in, w_in, h_out, w_out):
    # Fill the MXU M dimension (~256 rows on v6e/v7x) with b*h_in rows.
    b = max(1, min(32, 256 // max(h_in, 1)))
    # Keep the double-buffered in/out tiles + weights well under v7x's
    # 64 MiB VMEM (~40 MiB working-set cap).
    per_plane = 4 * (h_in * w_in + h_out * w_out)
    weights = 8 * (h_out * h_in + w_in * w_out)
    budget = 40 * 1024 * 1024 - weights
    b = max(1, min(b, budget // max(1, 2 * per_plane)))
    # Keep >= 2 parallel grid steps when possible (v7x: 2 TensorCores).
    if p > 1:
        b = min(b, -(-p // 2))
    return b


class Interpolate:
    """JAX/Pallas equivalent of the PyTorch Interpolate module."""

    def __init__(self, size, mode):
        self.size = (size, size) if isinstance(size, int) else tuple(size)
        self.mode = mode

    def __call__(self, x):
        # x: (N, C, H_in, W_in)
        n, c, h_in, w_in = x.shape
        h_out, w_out = self.size

        rh = _interp_matrix(h_out, h_in, self.mode)        # (H_out, H_in)
        rwt = _interp_matrix(w_out, w_in, self.mode).T     # (W_in, W_out)
        # TODO(synk): mode='nearest' could bypass the MXU entirely with a
        # gather/copy kernel (pure data movement); the exact one-hot matmul
        # path is used here for simplicity/robustness.

        p = n * c
        b = _pick_block_planes(p, h_in, w_in, h_out, w_out)
        p_pad = -(-p // b) * b

        x_flat = x.reshape(p, h_in, w_in)
        if p_pad != p:
            x_flat = jnp.pad(x_flat, ((0, p_pad - p), (0, 0), (0, 0)))

        out_flat = pl.pallas_call(
            _interp_kernel,
            out_shape=jax.ShapeDtypeStruct((p_pad, h_out, w_out), x.dtype),
            grid_spec=pltpu.PrefetchScalarGridSpec(
                num_scalar_prefetch=0,
                grid=(p_pad // b,),
                in_specs=[
                    pl.BlockSpec((b, h_in, w_in), lambda i: (i, 0, 0)),
                    pl.BlockSpec((w_in, w_out), lambda i: (0, 0)),
                    pl.BlockSpec((h_out, h_in), lambda i: (0, 0)),
                ],
                out_specs=pl.BlockSpec((b, h_out, w_out), lambda i: (i, 0, 0)),
            ),
            compiler_params=pltpu.CompilerParams(
                dimension_semantics=("parallel",),
                vmem_limit_bytes=48 * 1024 * 1024,
            ),
        )(x_flat, rwt, rh)

        return out_flat[:p].reshape(n, c, h_out, w_out)


if __name__ == "__main__":
    key = jax.random.PRNGKey(0)
    # Small NCHW feature-map shapes.
    N, C, H, W = 2, 4, 16, 16
    x = jax.random.normal(key, (N, C, H, W), dtype=jnp.float32)

    # --- bilinear upsample ---
    interp = Interpolate(size=(32, 32), mode="bilinear")
    y = jax.block_until_ready(interp(x))
    assert y.shape == (N, C, 32, 32), y.shape
    assert y.dtype == x.dtype
    # Half-pixel bilinear UPSAMPLE (no antialias) matches PyTorch
    # align_corners=False; jax.image.resize agrees for upsampling.
    ref = jax.image.resize(x, (N, C, 32, 32), method="bilinear")
    assert float(jnp.max(jnp.abs(y - ref))) < 1e-4

    # --- nearest upsample (PyTorch legacy 'nearest' = floor indexing) ---
    interp_nn = Interpolate(size=(32, 32), mode="nearest")
    y_nn = jax.block_until_ready(interp_nn(x))
    rows = np.floor(np.arange(32) * (H / 32.0)).astype(np.int32)
    cols = np.floor(np.arange(32) * (W / 32.0)).astype(np.int32)
    ref_nn = np.asarray(x)[:, :, rows][:, :, :, cols]
    assert float(np.max(np.abs(np.asarray(y_nn) - ref_nn))) < 1e-4

    print("KERNEL_OK")
</pallas_src>

<mosaic_0001>
module attributes {stable_mosaic.version = 11 : i64} {
  func.func @_interp_kernel(%arg0: i32, %arg1: memref<4x16x16xf32, #tpu.memory_space<vmem>>, %arg2: memref<16x32xf32, #tpu.memory_space<vmem>>, %arg3: memref<32x16xf32, #tpu.memory_space<vmem>>, %arg4: memref<4x32x32xf32, #tpu.memory_space<vmem>>) attributes {dimension_semantics = [#tpu.dimension_semantics<parallel>], iteration_bounds = array<i64: 2>, scalar_prefetch = 0 : i64, scratch_operands = 0 : i64, tpu.core_type = #tpu.core_type<tc>, window_params = [{transform_indices = @transform_0, window_bounds = array<i64: 4, 16, 16>}, {pipeline_mode = #tpu.pipeline_mode<synchronous>, transform_indices = @transform_1, window_bounds = array<i64: 16, 32>}, {pipeline_mode = #tpu.pipeline_mode<synchronous>, transform_indices = @transform_2, window_bounds = array<i64: 32, 16>}, {transform_indices = @transform_3, window_bounds = array<i64: 4, 32, 32>}]} {
    %c0 = arith.constant 0 : index
    %c0_0 = arith.constant 0 : index
    %c0_1 = arith.constant 0 : index
    %0 = vector.load %arg1[%c0, %c0_0, %c0_1] : memref<4x16x16xf32, #tpu.memory_space<vmem>>, vector<4x16x16xf32>
    %1 = vector.shape_cast %0 : vector<4x16x16xf32> to vector<64x16xf32>
    %c0_2 = arith.constant 0 : index
    %c0_3 = arith.constant 0 : index
    %2 = vector.load %arg2[%c0_2, %c0_3] : memref<16x32xf32, #tpu.memory_space<vmem>>, vector<16x32xf32>
    %cst = arith.constant dense<0.000000e+00> : vector<64x32xf32>
    %3 = tpu.matmul %1, %2, %cst {dimension_numbers = #tpu.dot_dimension_numbers<[1], [0], [0], [1], [0, 0, 1, 1], [], []>} : vector<64x16xf32>, vector<16x32xf32>, vector<64x32xf32> -> vector<64x32xf32>
    %c0_4 = arith.constant 0 : index
    %c0_5 = arith.constant 0 : index
    %4 = vector.load %arg3[%c0_4, %c0_5] : memref<32x16xf32, #tpu.memory_space<vmem>>, vector<32x16xf32>
    %5 = vector.extract_strided_slice %3 {offsets = [0, 0], sizes = [16, 32], strides = [1, 1]} : vector<64x32xf32> to vector<16x32xf32>
    %cst_6 = arith.constant dense<0.000000e+00> : vector<32x32xf32>
    %6 = tpu.matmul %4, %5, %cst_6 {dimension_numbers = #tpu.dot_dimension_numbers<[1], [0], [0], [1], [0, 0, 1, 1], [], []>} : vector<32x16xf32>, vector<16x32xf32>, vector<32x32xf32> -> vector<32x32xf32>
    %c0_7 = arith.constant 0 : index
    %c0_8 = arith.constant 0 : index
    %c0_9 = arith.constant 0 : index
    %7 = vector.load %arg4[%c0_7, %c0_8, %c0_9] : memref<4x32x32xf32, #tpu.memory_space<vmem>>, vector<1x32x32xf32>
    %8 = vector.shape_cast %7 : vector<1x32x32xf32> to vector<32x32xf32>
    %9 = vector.shape_cast %6 : vector<32x32xf32> to vector<1x32x32xf32>
    tpu.vector_store %arg4[%c0_7, %c0_8, %c0_9], %9 {strides = array<i32>} : memref<4x32x32xf32, #tpu.memory_space<vmem>>, vector<1x32x32xf32>,
    %10 = vector.extract_strided_slice %3 {offsets = [16, 0], sizes = [16, 32], strides = [1, 1]} : vector<64x32xf32> to vector<16x32xf32>
    %cst_10 = arith.constant dense<0.000000e+00> : vector<32x32xf32>
    %11 = tpu.matmul %4, %10, %cst_10 {dimension_numbers = #tpu.dot_dimension_numbers<[1], [0], [0], [1], [0, 0, 1, 1], [], []>} : vector<32x16xf32>, vector<16x32xf32>, vector<32x32xf32> -> vector<32x32xf32>
    %c1 = arith.constant 1 : index
    %c0_11 = arith.constant 0 : index
    %c0_12 = arith.constant 0 : index
    %12 = vector.load %arg4[%c1, %c0_11, %c0_12] : memref<4x32x32xf32, #tpu.memory_space<vmem>>, vector<1x32x32xf32>
    %13 = vector.shape_cast %12 : vector<1x32x32xf32> to vector<32x32xf32>
    %14 = vector.shape_cast %11 : vector<32x32xf32> to vector<1x32x32xf32>
    tpu.vector_store %arg4[%c1, %c0_11, %c0_12], %14 {strides = array<i32>} : memref<4x32x32xf32, #tpu.memory_space<vmem>>, vector<1x32x32xf32>,
    %15 = vector.extract_strided_slice %3 {offsets = [32, 0], sizes = [16, 32], strides = [1, 1]} : vector<64x32xf32> to vector<16x32xf32>
    %cst_13 = arith.constant dense<0.000000e+00> : vector<32x32xf32>
    %16 = tpu.matmul %4, %15, %cst_13 {dimension_numbers = #tpu.dot_dimension_numbers<[1], [0], [0], [1], [0, 0, 1, 1], [], []>} : vector<32x16xf32>, vector<16x32xf32>, vector<32x32xf32> -> vector<32x32xf32>
    %c2 = arith.constant 2 : index
    %c0_14 = arith.constant 0 : index
    %c0_15 = arith.constant 0 : index
    %17 = vector.load %arg4[%c2, %c0_14, %c0_15] : memref<4x32x32xf32, #tpu.memory_space<vmem>>, vector<1x32x32xf32>
    %18 = vector.shape_cast %17 : vector<1x32x32xf32> to vector<32x32xf32>
    %19 = vector.shape_cast %16 : vector<32x32xf32> to vector<1x32x32xf32>
    tpu.vector_store %arg4[%c2, %c0_14, %c0_15], %19 {strides = array<i32>} : memref<4x32x32xf32, #tpu.memory_space<vmem>>, vector<1x32x32xf32>,
    %20 = vector.extract_strided_slice %3 {offsets = [48, 0], sizes = [16, 32], strides = [1, 1]} : vector<64x32xf32> to vector<16x32xf32>
    %cst_16 = arith.constant dense<0.000000e+00> : vector<32x32xf32>
    %21 = tpu.matmul %4, %20, %cst_16 {dimension_numbers = #tpu.dot_dimension_numbers<[1], [0], [0], [1], [0, 0, 1, 1], [], []>} : vector<32x16xf32>, vector<16x32xf32>, vector<32x32xf32> -> vector<32x32xf32>
    %c3 = arith.constant 3 : index
    %c0_17 = arith.constant 0 : index
    %c0_18 = arith.constant 0 : index
    %22 = vector.load %arg4[%c3, %c0_17, %c0_18] : memref<4x32x32xf32, #tpu.memory_space<vmem>>, vector<1x32x32xf32>
    %23 = vector.shape_cast %22 : vector<1x32x32xf32> to vector<32x32xf32>
    %24 = vector.shape_cast %21 : vector<32x32xf32> to vector<1x32x32xf32>
    tpu.vector_store %arg4[%c3, %c0_17, %c0_18], %24 {strides = array<i32>} : memref<4x32x32xf32, #tpu.memory_space<vmem>>, vector<1x32x32xf32>,
    return
  }
  func.func @transform_0(%arg0: i32) -> (i32, i32, i32) {
    %c0_i32 = arith.constant 0 : i32
    %c0_i32_0 = arith.constant 0 : i32
    %c0_i32_1 = arith.constant 0 : i32
    return %arg0, %c0_i32, %c0_i32_0 : i32, i32, i32
  }
  func.func @transform_1(%arg0: i32) -> (i32, i32) {
    %c0_i32 = arith.constant 0 : i32
    %c0_i32_0 = arith.constant 0 : i32
    %c0_i32_1 = arith.constant 0 : i32
    return %c0_i32, %c0_i32_0 : i32, i32
  }
  func.func @transform_2(%arg0: i32) -> (i32, i32) {
    %c0_i32 = arith.constant 0 : i32
    %c0_i32_0 = arith.constant 0 : i32
    %c0_i32_1 = arith.constant 0 : i32
    return %c0_i32, %c0_i32_0 : i32, i32
  }
  func.func @transform_3(%arg0: i32) -> (i32, i32, i32) {
    %c0_i32 = arith.constant 0 : i32
    %c0_i32_0 = arith.constant 0 : i32
    %c0_i32_1 = arith.constant 0 : i32
    return %arg0, %c0_i32, %c0_i32_0 : i32, i32, i32
  }
}

</mosaic_0001>

<bundles_post_ra>
// kernel: tpu_custom_call.1
= control target key start
LH: loop header
LB: loop body
LE: loop exit
PB: predicated region body
PF: predicated region fallthrough
CT: control target
= control target key end

     0   :  { %8 = vsyncpa [#allocation3], 0  ;;  %s949_s0 = inlined_call_operand.hbm [shape: f32[8,16,16], index: 0, kind: input, shape index: {}]   ;;  %s950_s1 = inlined_call_operand.vmem [shape: f32[16,32], index: 1, kind: input, shape index: {}]   ;;  %s951_s2 = inlined_call_operand.vmem [shape: f32[32,16], index: 2, kind: input, shape index: {}]   ;;  %s952_s3 = inlined_call_operand.hbm [shape: f32[8,32,32], index: 3, kind: output, shape index: {}]  }
   0x1   :  { %10 = vsyncpa [#allocation3 + $0x1], 0 }
   0x2   :  { %11 = vsyncpa [#allocation4], 0 }
   0x3   :  { %13 = vsyncpa [#allocation4 + $0x1], 0  ;;  %s744_s12 = smov 0   ;;  %s746_s13 = smov 0  }
   0x4   :  { %s748_s14 = smov 0   ;;  %s750_s15 = smov 0  }
   0x5 LB: > { %s765_s16 = sadd.s32 4294967295, %s718_s15   ;;  %s512_s17 = sadd.s32 4294967294, %s718_s15   ;;  %s718_s15 = sphi %s750_s15, %s962_s15   ;;  %s714_s14 = sphi %s748_s14, %s961_s14   ;;  %s710_s13 = sphi %s746_s13, %s960_s13   ;;  %s706_s12 = sphi %s744_s12, %s959_s12  }
   0x6   : > { %s769_s18 = sadd.s32 1, %s718_s15   ;;  %s26_s19 = sadd.s32 1, %s714_s14 }
   0x7   : > { %s23_s20 = ssub.s32 %s718_s15, %s769_s18  ;;  %p33_p0 = scmp.ne.s32.totalorder %s714_s14, %s710_s13 }
   0x8   : > { %p24_p1 = scmp.eq.s32.totalorder %s23_s20, 0  ;;  %p34_p2 = scmp.eq.s32.totalorder %s718_s15, 0 }
   0x9   : > { %p39_p3 = scmp.ne.s32.totalorder %s710_s13, %s706_s12  ;;  %p40_p4 = scmp.eq.s32.totalorder %s765_s16, 0 }
   0xa   : > { %s781_s21 = scalar_select %p24_p1, %s714_s14, %s26_s19  }
   0xb   : > { %p783_p5 = por %p34_p2, %p33_p0  ;;  %p787_p6 = por %p40_p4, %p39_p3 }
   0xc   : > { %p105_p7 = scmp.eq.s32.totalorder %s765_s16, 1  ;;  %p111_p8 = scmp.eq.s32.totalorder %s512_s17, 1 }
   0xd   : > { %p584_p10 = scmp.lt.s32.totalorder %s718_s15, 2  ;;  %s137_s26 = sand.u32 1, %s714_s14  }
   0xe   : > { %p794_p11 = por %p105_p7, %p33_p0  ;;  %p798_p12 = por %p111_p8, %p39_p3 }
   0xf   : > { %s565_s27 = sshll.u32 %s718_s15, 6  ;;  %s515_s28 = sshll.u32 %s137_s26, 6 }
  0x10   : > { %s147_s4 = scalar_lea.hbm %s949_s0, %s565_s27  ;;  %s141_s6 = scalar_lea.vmem [#allocation2], %s515_s28 }
  0x11   : > { %s148_s5 = sshll.u32 %s147_s4, 4  ;;  %s150_s7 = sshll.u32 %s141_s6, 4  ;;  %s149_s5 = int_to_ptr.hbm [resolvable:$true] %s148_s5  ;;  %s151_s7 = int_to_ptr.vmem [resolvable:$true] %s150_s7 }
  0x12   : > { %p809_p13 = pnand %p584_p10, %p783_p5  ;;  %p519_p0 = scmp.ge.s32.totalorder %s718_s15, 1 }
  0x13   : > { %p158_p1 = scmp.lt.s32.totalorder %s718_s15, 3  ;;  %s138_s9 = scalar_lea.sflag [#allocation3], %s137_s26 }
  0x14   : > { %s622_s10 = sshra.s32 %s149_s5, 4  ;;  %p626_p3 = pneg %p809_p13  ;;  %s623_s10 = int_to_ptr.hbm [resolvable:$true] %s622_s10 }
  0x15   : > { %s624_s11 = scalar_lea.hbm %s623_s10, 64  ;;  %s629_s20 = scalar_lea.hbm %s949_s0, 128 }
  0x16   : > { %p625_p2 = scmp.ne.s32.totalorder %s623_s10, %s624_s11  ;;  %p630_p5 = scmp.lt.s32.totalorder %s623_s10, %s949_s0 }
  0x17   : > { %p631_p8 = scmp.lt.s32.totalorder %s629_s20, %s624_s11 }
  0x18   : > { %p627_p4 = pnand %p626_p3, %p625_p2 }
  0x19   : > { %p632_p10 = por %p631_p8, %p630_p5 }
  0x1a   : > { %p628_p7 = pneg %p627_p4 }
  0x1c   : > { %p633_p9 = pnand %p632_p10, %p628_p7 }
  0x1e   : > { %636 = shalt.err (!%p633_p9)
}
  0x1f   : > { %s720_s26 = smov 128   ;;  %s721_s28 = smov 8  }
  0x20   : > { %579 = dma.hbm_to_vmem [thread:$0]  (!%p809_p13), %s149_s5, 1024, %s151_s7, %s138_s9, %s720_s26, %s720_s26, %s721_s28  }
  0x21   : > { %p159_p2 = pnand %p519_p0, %p158_p1 }
  0x22   : > { %s830_s29 = sand.u32 (!%p159_p2), 1, %s710_s13  }
  0x23   : > { %162 = sbr.rel (%p159_p2) target bundleno = 374 (0x176), region = 32  ;;  %s520_s30 = sshll.u32 (!%p159_p2), %s830_s29, 6 }
  0x24   : > { %s165_s4 = scalar_lea.sflag (!%p159_p2), [#allocation3], %s830_s29  ;;  %s168_s6 = scalar_lea.vmem (!%p159_p2), [#allocation2], %s520_s30 }
  0x28   : > { %697 = dma.done.wait (%p787_p6), %s165_s4, 1024  }
  0x29   : > { %699 = vsyncadd (%p787_p6), %s165_s4, 4294966272  ;;  %v203_v0 = vld [vmem:[%s950_s1 + $0x8] sm:$0xff]  ;;  %v202_v1 = vld [vmem:[%s950_s1] sm:$0xff]  ;;  %vm204_vm0 = vcmask 130048   ;;  %s521_s26 = sshll.u32 %s830_s29, 7  ;;  %vm315_vm1 = vcmask 261120  }
  0x2a   : > { %243 = vmatpush.msra.mxu0 %v203_v0  ;;  %v194_v2 = vld [vmem:[%s168_s6] sm:$0xff]  ;;  %568 = vmatpush.msra.mxu2 %v203_v0  ;;  %v200_v3 = vld [vmem:[%s168_s6 + $0x30] sm:$0xff]  ;;  %v195_v4 = vld [vmem:[%s168_s6 + $0x8] sm:$0xff]  ;;  %s881_s28 = scalar_lea.vmem [#allocation5], %s521_s26  ;;  %s567_s30 = sshll.u32 %s765_s16, 7 }
  0x2b   : > { %v201_v5 = vld [vmem:[%s168_s6 + $0x38] sm:$0xff]  ;;  %v196_v6 = vld [vmem:[%s168_s6 + $0x10] sm:$0xff]  ;;  %v198_v8 = vld [vmem:[%s168_s6 + $0x20] sm:$0xff]  ;;  %s435_s8 = scalar_lea.hbm %s952_s3, %s567_s30  ;;  %s436_s5 = sshll.u32 %s881_s28, 4  ;;  %s437_s5 = int_to_ptr.vmem [resolvable:$true] %s436_s5 }
  0x2c   : > { %244 = vmatpush.msra.mxu0 %v202_v1  ;;  %569 = vmatpush.msra.mxu2 %v202_v1  ;;  %v197_v7 = vld [vmem:[%s168_s6 + $0x18] sm:$0xff]  ;;  %v199_v9 = vld [vmem:[%s168_s6 + $0x28] sm:$0xff]  ;;  %v272_v13 = vld [vmem:[%s951_s2 + $0x10] sm:$0xff]  ;;  %s438_s7 = sshll.u32 %s435_s8, 4  ;;  %s423_s9 = scalar_lea.sflag [#allocation4], %s830_s29  ;;  %s439_s7 = int_to_ptr.hbm [resolvable:$true] %s438_s7 }
  0x2d   : > { %522 = vmatmul.msk.f32.vlgmr.msra.gmra.mxu0 %vm204_vm0, %v194_v2  ;;  %528 = vmatmul.msk.f32.vlgmr.msra.gmra.mxu2 %vm204_vm0, %v200_v3  ;;  %v270_v14 = vld [vmem:[%s951_s2] sm:$0xff]  ;;  %v273_v17 = vld [vmem:[%s951_s2 + $0x18] sm:$0xff]  ;;  %v271_v18 = vld [vmem:[%s951_s2 + $0x8] sm:$0xff]  ;;  %s666_s23 = sshra.s32 %s439_s7, 4  ;;  %s672_s17 = scalar_lea.hbm %s952_s3, 256  ;;  %s667_s23 = int_to_ptr.hbm [resolvable:$true] %s666_s23 }
  0x2e   : > { %s668_s10 = scalar_lea.hbm %s667_s23, 128  ;;  %p673_p0 = scmp.lt.s32.totalorder %s667_s23, %s952_s3 }
  0x2f   : > { %p669_p6 = scmp.ne.s32.totalorder %s667_s23, %s668_s10  ;;  %p674_p1 = scmp.lt.s32.totalorder %s672_s17, %s668_s10 }
  0x31   : > { %p670_p9 = pnand %p669_p6, %p794_p11  ;;  %p675_p3 = por %p674_p1, %p673_p0 }
  0x33   : > { %p671_p13 = pneg %p670_p9 }
  0x35   : > { %523 = vmatmul.msk.f32.gmra.mxu0 %vm204_vm0, %v195_v4  ;;  %529 = vmatmul.msk.f32.gmra.mxu2 %vm204_vm0, %v201_v5  ;;  %p676_p4 = pnand %p675_p3, %p671_p13 }
  0x3d   : > { %524 = vmatmul.msk.f32.gmra.mxu0 %vm204_vm0, %v196_v6 }
  0x45   : > { %525 = vmatmul.msk.f32.gmra.mxu0 %vm204_vm0, %v197_v7 }
  0x4d   : > { %526 = vmatmul.msk.f32.gmra.mxu0 %vm204_vm0, %v198_v8 }
  0x55   : > { %527 = vmatmul.msk.f32.gmra.mxu0 %vm204_vm0, %v199_v9 }
  0xaa   : > { %v246_v10 = vpop.f32.mrf.mxu0 }
  0xb0   : > { %v264_v11 = vpop.f32.mrf.mxu2 }
  0xb2   : > { %v249_v12 = vpop.f32.mrf.mxu0 }
  0xb3   : > { %300 = vmatpush.msra.mxu1 %v249_v12  ;;  %570 = vmatpush.msra.mxu3 %v249_v12 }
  0xb5   : > { %301 = vmatpush.msra.mxu1 %v246_v10  ;;  %571 = vmatpush.msra.mxu3 %v246_v10 }
  0xb6   : > { %532 = vmatmul.msk.f32.vlgmr.msra.gmra.mxu3 %vm204_vm0, %v272_v13  ;;  %530 = vmatmul.msk.f32.vlgmr.msra.gmra.mxu1 %vm204_vm0, %v270_v14 }
  0xb8   : > { %v267_v15 = vpop.f32.mrf.mxu2 }
  0xb9   : > { %402 = vmatpush.msrb.mxu1 %v267_v15 }
  0xba   : > { %v252_v16 = vpop.f32.mrf.mxu0 }
  0xbb   : > { %403 = vmatpush.msrb.mxu1 %v264_v11 }
  0xbe   : > { %533 = vmatmul.msk.f32.gmra.mxu3 %vm204_vm0, %v273_v17  ;;  %531 = vmatmul.msk.f32.gmra.mxu1 %vm204_vm0, %v271_v18 }
  0xc2   : > { %v255_v19 = vpop.f32.mrf.mxu0 }
  0xc3   : > { %334 = vmatpush.msrb.mxu2 %v255_v19 }
  0xc5   : > { %335 = vmatpush.msrb.mxu2 %v252_v16 }
  0xc6   : > { %534 = vmatmul.msk.f32.vlgmr.msrb.gmra.mxu2 %vm204_vm0, %v270_v14  ;;  %550 = vmatmul.msk.f32.vlgmr.msrb.gmra.mxu1 %vm204_vm0, %v270_v14 }
  0xca   : > { %v258_v20 = vpop.f32.mrf.mxu0 }
  0xce   : > { %535 = vmatmul.msk.f32.gmra.mxu2 %vm204_vm0, %v271_v18  ;;  %551 = vmatmul.msk.f32.gmra.mxu1 %vm204_vm0, %v271_v18 }
  0xd2   : > { %v261_v21 = vpop.f32.mrf.mxu0 }
  0xd3   : > { %368 = vmatpush.msrb.mxu3 %v261_v21 }
  0xd5   : > { %369 = vmatpush.msrb.mxu3 %v258_v20 }
  0xd6   : > { %542 = vmatmul.msk.f32.vlgmr.msrb.gmra.mxu3 %vm204_vm0, %v270_v14  ;;  %536 = vmatmul.msk.f32.gmra.mxu2 %vm204_vm0, %v272_v13 }
  0xd7   : > { %552 = vmatmul.msk.f32.gmra.mxu1 %vm204_vm0, %v272_v13 }
  0xde   : > { %543 = vmatmul.msk.f32.gmra.mxu3 %vm204_vm0, %v271_v18  ;;  %537 = vmatmul.msk.f32.gmra.mxu2 %vm204_vm0, %v273_v17 }
  0xdf   : > { %553 = vmatmul.msk.f32.gmra.mxu1 %vm204_vm0, %v273_v17 }
  0xe6   : > { %544 = vmatmul.msk.f32.gmra.mxu3 %vm204_vm0, %v272_v13 }
  0xee   : > { %545 = vmatmul.msk.f32.gmra.mxu3 %vm204_vm0, %v273_v17 }
 0x133   : > { %v303_v22 = vpop.f32.mrf.mxu1 }
 0x134   : > { %316 = vst.msk [vmem:[%s881_s28] sm:$0xff] %vm315_vm1, %v303_v22 }
 0x139   : > { %v309_v23 = vpop.f32.mrf.mxu3 }
 0x13a   : > { %318 = vst.msk [vmem:[%s881_s28 + $0x10] sm:$0xff] %vm315_vm1, %v309_v23 }
 0x13b   : > { %v306_v24 = vpop.f32.mrf.mxu1 }
 0x13c   : > { %317 = vst.msk [vmem:[%s881_s28 + $0x8] sm:$0xff] %vm315_vm1, %v306_v24 }
 0x141   : > { %v312_v25 = vpop.f32.mrf.mxu3 }
 0x142   : > { %319 = vst.msk [vmem:[%s881_s28 + $0x18] sm:$0xff] %vm315_vm1, %v312_v25 }
 0x143   : > { %v405_v26 = vpop.f32.mrf.mxu1 }
 0x144   : > { %554 = vst.msk [vmem:[%s881_s28 + $0x60] sm:$0xff] %vm315_vm1, %v405_v26 }
 0x149   : > { %v337_v27 = vpop.f32.mrf.mxu2 }
 0x14a   : > { %538 = vst.msk [vmem:[%s881_s28 + $0x20] sm:$0xff] %vm315_vm1, %v337_v27 }
 0x14b   : > { %v408_v28 = vpop.f32.mrf.mxu1 }
 0x14c   : > { %555 = vst.msk [vmem:[%s881_s28 + $0x68] sm:$0xff] %vm315_vm1, %v408_v28 }
 0x151   : > { %v340_v29 = vpop.f32.mrf.mxu2 }
 0x152   : > { %539 = vst.msk [vmem:[%s881_s28 + $0x28] sm:$0xff] %vm315_vm1, %v340_v29 }
 0x154   : > { %v411_v30 = vpop.f32.mrf.mxu1 }
 0x155   : > { %556 = vst.msk [vmem:[%s881_s28 + $0x70] sm:$0xff] %vm315_vm1, %v411_v30 }
 0x159   : > { %v371_v31 = vpop.f32.mrf.mxu3  ;;  %v343_v32 = vpop.f32.mrf.mxu2 }
 0x15a   : > { %546 = vst.msk [vmem:[%s881_s28 + $0x40] sm:$0xff] %vm315_vm1, %v371_v31 }
 0x15b   : > { %540 = vst.msk [vmem:[%s881_s28 + $0x30] sm:$0xff] %vm315_vm1, %v343_v32 }
 0x15c   : > { %v414_v33 = vpop.f32.mrf.mxu1 }
 0x15d   : > { %557 = vst.msk [vmem:[%s881_s28 + $0x78] sm:$0xff] %vm315_vm1, %v414_v33 }
 0x161   : > { %v374_v34 = vpop.f32.mrf.mxu3  ;;  %v346_v35 = vpop.f32.mrf.mxu2 }
 0x162   : > { %547 = vst.msk [vmem:[%s881_s28 + $0x48] sm:$0xff] %vm315_vm1, %v374_v34 }
 0x163   : > { %541 = vst.msk [vmem:[%s881_s28 + $0x38] sm:$0xff] %vm315_vm1, %v346_v35 }
 0x169   : > { %v377_v36 = vpop.f32.mrf.mxu3 }
 0x16a   : > { %548 = vst.msk [vmem:[%s881_s28 + $0x50] sm:$0xff] %vm315_vm1, %v377_v36 }
 0x171   : > { %v380_v37 = vpop.f32.mrf.mxu3 }
 0x172   : > { %549 = vst.msk [vmem:[%s881_s28 + $0x58] sm:$0xff] %vm315_vm1, %v380_v37 }
 0x173   : > { %679 = shalt.err (!%p676_p4)
}
 0x174   : > { %s722_s29 = smov 128   ;;  %s723_s22 = smov 8  }
 0x175   : > { %574 = dma.vmem_to_hbm [thread:$0]  (%p794_p11), %s437_s5, 2048, %s439_s7, %s423_s9, %s722_s29, %s722_s29, %s723_s22  }
 0x176 PF: > { %s453_s27 = sand.u32 1, %s706_s12   ;;  %p958_p7 = scmp.ge.s32.totalorder %s718_s15, 2 }
 0x177   : > { %s454_s26 = scalar_lea.sflag [#allocation4], %s453_s27 }
 0x178   : > { %p581_p5 = pnand %p958_p7, %p798_p12 }
 0x17a   : > { %p582_p8 = pneg %p581_p5 }
 0x17c   : > { %701 = dma.done.wait (%p582_p8), %s454_s26, 2048  }
 0x17d   : > { %703 = vsyncadd (%p582_p8), %s454_s26, 4294965248  ;;  %p16_p10 = scmp.ge.s32.totalorder %s769_s18, 4   ;;  %s959_s12 = smov %s710_s13 }
 0x17e   : > { %s960_s13 = smov %s714_s14  ;;  %s961_s14 = smov %s781_s21 }
 0x17f   : > { %s962_s15 = smov %s769_s18  ;;  %18 = sbr.rel (!%p16_p10) target bundleno = 5 (0x5), region = 80 }
 0x184   :  { %460 = vsyncpa [#allocation3], 1 }
 0x185   :  { %462 = vsyncpa [#allocation3 + $0x1], 1 }
 0x186   :  { %463 = vsyncpa [#allocation4], 1 }
 0x187   :  { %465 = vsyncpa [#allocation4 + $0x1], 1 }

</bundles_post_ra>
